<compile_context>
chip_gen: v5e
topology: v5e:2x2
jax: 0.10.0
libtpu: 0.0.40
codegen_flags: <defaults>
</compile_context>

<pallas_src>
import functools

import jax
import jax.numpy as jnp
from jax.experimental import pallas as pl
from jax.experimental.pallas import tpu as pltpu


# ---------------------------------------------------------------------------
# Single-pass kernel: pool + SE-MLP + rescale on one VMEM-resident row block.
# ---------------------------------------------------------------------------
def _channel_attention_kernel(x_ref, w1_ref, b1_ref, w2_ref, b2_ref, o_ref,
                              *, bb, c, inv_hw):
    # x_ref / o_ref : (bb*c, HWb)   rows = (batch, channel), lanes = spatial
    # w1_ref: (c, c_red)  b1_ref: (1, c_red)  w2_ref: (c_red, c)  b2_ref: (1, c)
    # Global average pool: accumulate in f32 without an f32 tile copy.
    sums = jnp.sum(x_ref[...], axis=-1, keepdims=True, dtype=jnp.float32)  # (bb*c, 1)
    means = sums.reshape(bb, c) * inv_hw                                   # (bb, c)

    # Squeeze-excite MLP, batched over the folded batch dimension (M = bb).
    h = jnp.dot(means, w1_ref[...], preferred_element_type=jnp.float32) + b1_ref[...]
    h = jnp.maximum(h, 0.0)                                                # (bb, c_red)
    a = jnp.dot(h, w2_ref[...], preferred_element_type=jnp.float32) + b2_ref[...]
    a = jax.nn.sigmoid(a)                                                  # (bb, c)

    # (rows, 1) * (rows, HWb) lowers to a per-row lane-splat vmul; no full-tile
    # broadcast intermediate.  Store in the native dtype (one vmul + one vst / vreg).
    scale = a.reshape(bb * c, 1).astype(o_ref.dtype)                       # (bb*c, 1)
    o_ref[...] = x_ref[...] * scale


# ---------------------------------------------------------------------------
# Two-pass fallback kernels (used when one batch's (C, HW) slab is too big).
# ---------------------------------------------------------------------------
def _pool_sum_kernel(x_ref, s_ref):
    # grid = (row_blocks [parallel], spatial_blocks [arbitrary, reduction last])
    @pl.when(pl.program_id(1) == 0)
    def _():
        s_ref[...] = jnp.zeros_like(s_ref)
    s_ref[...] += jnp.sum(x_ref[...], axis=-1, keepdims=True, dtype=jnp.float32)


def _rescale_kernel(x_ref, scale_ref, o_ref):
    o_ref[...] = x_ref[...] * scale_ref[...].astype(o_ref.dtype)


# ---------------------------------------------------------------------------
# Helpers
# ---------------------------------------------------------------------------
def _tpu_vmem_bytes():
    try:
        info = pltpu.get_tpu_info()
        return int(getattr(info, "vmem_capacity_bytes", 64 << 20))
    except Exception:
        return 64 << 20   # conservative (v7x per-TensorCore)


def _row_multiple(dtype):
    # Sublane packing: f32 -> 8, bf16 -> 16, int8/fp8 -> 32 rows per tile group.
    return {4: 8, 2: 16, 1: 32}.get(jnp.dtype(dtype).itemsize, 8)


def _divisors(n):
    return [d for d in range(1, n + 1) if n % d == 0]


def _two_pass(xf, w1t, b1r, w2t, b2r, *, B, C, HW, HWb, itemsize, row_mult,
              pipeline_budget, phys_vmem, out_dtype):
    BC = B * C
    tile_target = max(pipeline_budget // 4, row_mult * 128 * itemsize)

    # Spatial block: largest 128-multiple divisor of HWb that keeps a minimum-row
    # tile within budget; ragged HWb falls back to a full-extent trailing block.
    if HWb % 128 == 0:
        ts_cands = [t for t in range(128, HWb + 1, 128) if HWb % t == 0]
        ts_fit = [t for t in ts_cands if row_mult * t * itemsize <= tile_target]
        TS = max(ts_fit) if ts_fit else 128
    else:
        TS = HWb

    # Row block: largest packing-aligned divisor of B*C with the tile within budget.
    row_cands = [r for r in range(row_mult, BC + 1, row_mult) if BC % r == 0] or [BC]
    row_fit = [r for r in row_cands if r * TS * itemsize <= tile_target]
    R = max(row_fit) if row_fit else min(row_cands)

    tile_bytes = R * TS * itemsize
    vmem_limit = int(min(phys_vmem * 3 // 4,
                         max(32 << 20, 4 * tile_bytes + (4 << 20))))
    grid = (BC // R, HWb // TS)

    # Pass 1: pooled per-row sums (2R+1W total HBM traffic across both passes).
    sums = pl.pallas_call(
        _pool_sum_kernel,
        out_shape=jax.ShapeDtypeStruct((BC, 1), jnp.float32),
        grid=grid,
        in_specs=[pl.BlockSpec((R, TS), lambda i, j: (i, j))],
        out_specs=pl.BlockSpec((R, 1), lambda i, j: (i, 0)),
        compiler_params=pltpu.CompilerParams(
            dimension_semantics=("parallel", "arbitrary"),
            vmem_limit_bytes=vmem_limit,
        ),
    )(xf)

    # Tiny SE MLP between the two passes in plain JAX (a few KFLOPs).
    means = sums.reshape(B, C) * (1.0 / HW)
    h = jnp.maximum(jnp.dot(means, w1t) + b1r, 0.0)
    a = jax.nn.sigmoid(jnp.dot(h, w2t) + b2r)
    scale = a.reshape(BC, 1)

    # Pass 2: fully parallel tiled elementwise rescale (uses both TCs on v7x).
    out = pl.pallas_call(
        _rescale_kernel,
        out_shape=jax.ShapeDtypeStruct((BC, HWb), out_dtype),
        grid=grid,
        in_specs=[pl.BlockSpec((R, TS), lambda i, j: (i, j)),
                  pl.BlockSpec((R, 1), lambda i, j: (i, 0))],
        out_specs=pl.BlockSpec((R, TS), lambda i, j: (i, j)),
        compiler_params=pltpu.CompilerParams(
            dimension_semantics=("parallel", "parallel"),
            vmem_limit_bytes=vmem_limit,
        ),
    )(xf, scale)
    return out


# ---------------------------------------------------------------------------
# Public wrapper
# ---------------------------------------------------------------------------
def channel_attention_forward(x, w1, b1, w2, b2, *, force_two_pass=False):
    """x: (B, C, H, W) NCHW.  w1: (C_red, C), b1: (C_red,), w2: (C, C_red), b2: (C,).
    (1x1 conv weights with the trailing 1x1 spatial dims already squeezed.)"""
    B, C, H, W = x.shape
    C_red = w1.shape[0]
    HW = H * W
    itemsize = jnp.dtype(x.dtype).itemsize
    row_mult = _row_multiple(x.dtype)

    # Generation-aware budgeting: the per-step pipeline footprint is ~2x input tile
    # + 2x output tile (double buffering) + params; keep it under min(32 MiB, VMEM/2).
    phys_vmem = _tpu_vmem_bytes()
    pipeline_budget = min(32 << 20, phys_vmem // 2)

    # Lane handling: only pad when HW is well below one lane group (masked stores
    # would dominate); otherwise keep the exact trailing extent to avoid the extra
    # HBM passes of an XLA pad + slice around the kernel.
    if HW < 128:
        HWb, padded = 128, True
    else:
        HWb, padded = HW, False

    xf = x.reshape(B, C, HW)
    if padded:
        xf = jnp.pad(xf, ((0, 0), (0, 0), (0, HWb - HW)))   # zeros don't affect sums
    xf = xf.reshape(B * C, HWb)

    # Pre-transpose / pre-cast the tiny MLP parameters once in the wrapper.
    w1t = jnp.transpose(w1).astype(jnp.float32)              # (C, C_red)
    w2t = jnp.transpose(w2).astype(jnp.float32)              # (C_red, C)
    b1r = b1.reshape(1, C_red).astype(jnp.float32)
    b2r = b2.reshape(1, C).astype(jnp.float32)
    params_bytes = 4 * (2 * C * C_red + C_red + C)

    def tile_bytes(bb):
        return bb * C * HWb * itemsize

    valid = [d for d in _divisors(B) if d == B or (d * C) % row_mult == 0]
    fitting = [d for d in valid
               if 4 * tile_bytes(d) + params_bytes <= pipeline_budget]

    if fitting and not force_two_pass:
        # Prefer pipeline depth: largest Bb that still leaves >= ~8 grid steps
        # (DMA/compute overlap + v7x megacore sharding); otherwise maximize steps.
        target_steps = min(8, B)
        cands = [d for d in fitting if B // d >= target_steps]
        Bb = max(cands) if cands else min(fitting)
        rows = Bb * C
        grid = (B // Bb,)
        vmem_limit = int(min(phys_vmem * 3 // 4,
                             max(32 << 20,
                                 4 * tile_bytes(Bb) + params_bytes + (4 << 20))))

        kernel = functools.partial(_channel_attention_kernel,
                                   bb=Bb, c=C, inv_hw=1.0 / HW)
        out = pl.pallas_call(
            kernel,
            out_shape=jax.ShapeDtypeStruct((B * C, HWb), x.dtype),
            grid=grid,
            in_specs=[
                pl.BlockSpec((rows, HWb), lambda i: (i, 0)),
                pl.BlockSpec((C, C_red), lambda i: (0, 0)),
                pl.BlockSpec((1, C_red), lambda i: (0, 0)),
                pl.BlockSpec((C_red, C), lambda i: (0, 0)),
                pl.BlockSpec((1, C), lambda i: (0, 0)),
            ],
            out_specs=pl.BlockSpec((rows, HWb), lambda i: (i, 0)),
            compiler_params=pltpu.CompilerParams(
                dimension_semantics=("parallel",),
                vmem_limit_bytes=vmem_limit,
            ),
        )(xf, w1t, b1r, w2t, b2r)
    else:
        out = _two_pass(xf, w1t, b1r, w2t, b2r, B=B, C=C, HW=HW, HWb=HWb,
                        itemsize=itemsize, row_mult=row_mult,
                        pipeline_budget=pipeline_budget, phys_vmem=phys_vmem,
                        out_dtype=x.dtype)

    out = out.reshape(B, C, HWb)
    if padded:
        out = out[:, :, :HW]
    return out.reshape(B, C, H, W)


def _reference(x, w1, b1, w2, b2):
    # pure-JAX reference of the PyTorch forward
    y = jnp.mean(x, axis=(2, 3), keepdims=True)                       # (B,C,1,1)
    y = jnp.einsum("bcxy,rc->brxy", y, w1) + b1[None, :, None, None]  # conv1x1
    y = jnp.maximum(y, 0.0)
    y = jnp.einsum("brxy,cr->bcxy", y, w2) + b2[None, :, None, None]  # conv1x1
    y = jax.nn.sigmoid(y)
    return x * y


if __name__ == "__main__":
    B, C, H, W = 2, 16, 16, 16
    reduction = 8
    C_red = C // reduction

    key = jax.random.PRNGKey(0)
    kx, k1, kb1, k2, kb2 = jax.random.split(key, 5)

    x = jax.random.normal(kx, (B, C, H, W), dtype=jnp.float32)
    # deterministic synthetic parameters (shapes from nn.Conv2d(C, C_red, 1) etc.,
    # with the trailing 1x1 spatial dims squeezed)
    w1 = jax.random.normal(k1, (C_red, C), dtype=jnp.float32) * 0.25
    b1 = jax.random.normal(kb1, (C_red,), dtype=jnp.float32) * 0.1
    w2 = jax.random.normal(k2, (C, C_red), dtype=jnp.float32) * 0.25
    b2 = jax.random.normal(kb2, (C,), dtype=jnp.float32) * 0.1

    ref = _reference(x, w1, b1, w2, b2)

    # Single-pass path (grid length >= 2 at this shape: one batch per step).
    out = channel_attention_forward(x, w1, b1, w2, b2)
    out = jax.block_until_ready(out)
    assert out.shape == x.shape
    assert jnp.allclose(out, ref, atol=1e-5, rtol=1e-5), "single-pass mismatch"

    # Two-pass fallback path (forced; normally used only when one batch's slab
    # exceeds the per-step VMEM budget).
    out2 = channel_attention_forward(x, w1, b1, w2, b2, force_two_pass=True)
    out2 = jax.block_until_ready(out2)
    assert jnp.allclose(out2, ref, atol=1e-5, rtol=1e-5), "two-pass mismatch"

    print("KERNEL_OK")
</pallas_src>

<mosaic_0001>
module attributes {stable_mosaic.version = 11 : i64} {
  func.func @_channel_attention_kernel(%arg0: i32, %arg1: memref<16x256xf32, #tpu.memory_space<vmem>>, %arg2: memref<16x2xf32, #tpu.memory_space<vmem>>, %arg3: memref<1x2xf32, #tpu.memory_space<vmem>>, %arg4: memref<2x16xf32, #tpu.memory_space<vmem>>, %arg5: memref<1x16xf32, #tpu.memory_space<vmem>>, %arg6: memref<16x256xf32, #tpu.memory_space<vmem>>) attributes {dimension_semantics = [#tpu.dimension_semantics<parallel>], iteration_bounds = array<i64: 2>, scalar_prefetch = 0 : i64, scratch_operands = 0 : i64, tpu.core_type = #tpu.core_type<tc>, window_params = [{transform_indices = @transform_0, window_bounds = array<i64: 16, 256>}, {pipeline_mode = #tpu.pipeline_mode<synchronous>, transform_indices = @transform_1, window_bounds = array<i64: 16, 2>}, {pipeline_mode = #tpu.pipeline_mode<synchronous>, transform_indices = @transform_2, window_bounds = array<i64: 1, 2>}, {pipeline_mode = #tpu.pipeline_mode<synchronous>, transform_indices = @transform_3, window_bounds = array<i64: 2, 16>}, {pipeline_mode = #tpu.pipeline_mode<synchronous>, transform_indices = @transform_4, window_bounds = array<i64: 1, 16>}, {transform_indices = @transform_5, window_bounds = array<i64: 16, 256>}]} {
    %c0 = arith.constant 0 : index
    %c0_0 = arith.constant 0 : index
    %0 = vector.load %arg1[%c0, %c0_0] : memref<16x256xf32, #tpu.memory_space<vmem>>, vector<16x256xf32>
    %cst = arith.constant dense<0.000000e+00> : vector<16xf32>
    %1 = vector.multi_reduction <add>, %0, %cst [1] : vector<16x256xf32> to vector<16xf32>
    %2 = vector.shape_cast %1 : vector<16xf32> to vector<16x1xf32>
    %3 = vector.shape_cast %2 : vector<16x1xf32> to vector<1x16xf32>
    %cst_1 = arith.constant 3.906250e-03 : f32
    %4 = vector.broadcast %cst_1 : f32 to vector<1x16xf32>
    %5 = arith.mulf %3, %4 : vector<1x16xf32>
    %c0_2 = arith.constant 0 : index
    %c0_3 = arith.constant 0 : index
    %6 = vector.load %arg2[%c0_2, %c0_3] : memref<16x2xf32, #tpu.memory_space<vmem>>, vector<16x2xf32>
    %cst_4 = arith.constant dense<0.000000e+00> : vector<1x2xf32>
    %7 = tpu.matmul %5, %6, %cst_4 {dimension_numbers = #tpu.dot_dimension_numbers<[1], [0], [0], [1], [0, 0, 1, 1], [], []>} : vector<1x16xf32>, vector<16x2xf32>, vector<1x2xf32> -> vector<1x2xf32>
    %c0_5 = arith.constant 0 : index
    %c0_6 = arith.constant 0 : index
    %8 = vector.load %arg3[%c0_5, %c0_6] : memref<1x2xf32, #tpu.memory_space<vmem>>, vector<1x2xf32>
    %9 = arith.addf %7, %8 : vector<1x2xf32>
    %cst_7 = arith.constant 0.000000e+00 : f32
    %10 = vector.broadcast %cst_7 : f32 to vector<1x2xf32>
    %11 = arith.maximumf %9, %10 : vector<1x2xf32>
    %c0_8 = arith.constant 0 : index
    %c0_9 = arith.constant 0 : index
    %12 = vector.load %arg4[%c0_8, %c0_9] : memref<2x16xf32, #tpu.memory_space<vmem>>, vector<2x16xf32>
    %cst_10 = arith.constant dense<0.000000e+00> : vector<1x16xf32>
    %13 = tpu.matmul %11, %12, %cst_10 {dimension_numbers = #tpu.dot_dimension_numbers<[1], [0], [0], [1], [0, 0, 1, 1], [], []>} : vector<1x2xf32>, vector<2x16xf32>, vector<1x16xf32> -> vector<1x16xf32>
    %c0_11 = arith.constant 0 : index
    %c0_12 = arith.constant 0 : index
    %14 = vector.load %arg5[%c0_11, %c0_12] : memref<1x16xf32, #tpu.memory_space<vmem>>, vector<1x16xf32>
    %15 = arith.addf %13, %14 : vector<1x16xf32>
    %16 = arith.negf %15 : vector<1x16xf32>
    %17 = math.exp %16 : vector<1x16xf32>
    %cst_13 = arith.constant 1.000000e+00 : f32
    %18 = vector.broadcast %cst_13 : f32 to vector<1x16xf32>
    %19 = arith.addf %18, %17 : vector<1x16xf32>
    %20 = arith.divf %18, %19 : vector<1x16xf32>
    %21 = vector.shape_cast %20 : vector<1x16xf32> to vector<16x1xf32>
    %c0_14 = arith.constant 0 : index
    %c0_15 = arith.constant 0 : index
    %22 = vector.load %arg1[%c0_14, %c0_15] : memref<16x256xf32, #tpu.memory_space<vmem>>, vector<16x256xf32>
    %23 = vector.broadcast %21 : vector<16x1xf32> to vector<16x256xf32>
    %24 = arith.mulf %22, %23 : vector<16x256xf32>
    %c0_16 = arith.constant 0 : index
    %c0_17 = arith.constant 0 : index
    %25 = vector.load %arg6[%c0_16, %c0_17] : memref<16x256xf32, #tpu.memory_space<vmem>>, vector<16x256xf32>
    tpu.vector_store %arg6[%c0_16, %c0_17], %24 {strides = array<i32>} : memref<16x256xf32, #tpu.memory_space<vmem>>, vector<16x256xf32>,
    return
  }
  func.func @transform_0(%arg0: i32) -> (i32, i32) {
    %c0_i32 = arith.constant 0 : i32
    %c0_i32_0 = arith.constant 0 : i32
    return %arg0, %c0_i32 : i32, i32
  }
  func.func @transform_1(%arg0: i32) -> (i32, i32) {
    %c0_i32 = arith.constant 0 : i32
    %c0_i32_0 = arith.constant 0 : i32
    %c0_i32_1 = arith.constant 0 : i32
    return %c0_i32, %c0_i32_0 : i32, i32
  }
  func.func @transform_2(%arg0: i32) -> (i32, i32) {
    %c0_i32 = arith.constant 0 : i32
    %c0_i32_0 = arith.constant 0 : i32
    %c0_i32_1 = arith.constant 0 : i32
    return %c0_i32, %c0_i32_0 : i32, i32
  }
  func.func @transform_3(%arg0: i32) -> (i32, i32) {
    %c0_i32 = arith.constant 0 : i32
    %c0_i32_0 = arith.constant 0 : i32
    %c0_i32_1 = arith.constant 0 : i32
    return %c0_i32, %c0_i32_0 : i32, i32
  }
  func.func @transform_4(%arg0: i32) -> (i32, i32) {
    %c0_i32 = arith.constant 0 : i32
    %c0_i32_0 = arith.constant 0 : i32
    %c0_i32_1 = arith.constant 0 : i32
    return %c0_i32, %c0_i32_0 : i32, i32
  }
  func.func @transform_5(%arg0: i32) -> (i32, i32) {
    %c0_i32 = arith.constant 0 : i32
    %c0_i32_0 = arith.constant 0 : i32
    return %arg0, %c0_i32 : i32, i32
  }
}

</mosaic_0001>

<bundles_post_ra>
// kernel: tpu_custom_call.1
= control target key start
LH: loop header
LB: loop body
LE: loop exit
PB: predicated region body
PF: predicated region fallthrough
CT: control target
= control target key end

     0   :  { %10 = vsyncpa [#allocation3], 0  ;;  %s831_s0 = inlined_call_operand.hbm [shape: f32[32,256], index: 0, kind: input, shape index: {}]   ;;  %s832_s1 = inlined_call_operand.vmem [shape: f32[16,2], index: 1, kind: input, shape index: {}]   ;;  %s833_s2 = inlined_call_operand.vmem [shape: f32[1,2], index: 2, kind: input, shape index: {}]   ;;  %s834_s3 = inlined_call_operand.vmem [shape: f32[2,16], index: 3, kind: input, shape index: {}]   ;;  %s835_s4 = inlined_call_operand.vmem [shape: f32[1,16], index: 4, kind: input, shape index: {}]   ;;  %s836_s5 = inlined_call_operand.hbm [shape: f32[32,256], index: 5, kind: output, shape index: {}]  }
   0x1   :  { %12 = vsyncpa [#allocation3 + $0x1], 0 }
   0x2   :  { %13 = vsyncpa [#allocation4], 0 }
   0x3   :  { %15 = vsyncpa [#allocation4 + $0x1], 0  ;;  %s669_s18 = smov 0   ;;  %s671_s19 = smov 0  }
   0x4   :  { %s673_s20 = smov 0   ;;  %s675_s21 = smov 0  }
   0x5 LB: > { %s690_s22 = sadd.s32 4294967295, %s633_s21   ;;  %s456_s23 = sadd.s32 4294967294, %s633_s21   ;;  %s633_s21 = sphi %s675_s21, %s846_s21   ;;  %s629_s20 = sphi %s673_s20, %s845_s20   ;;  %s625_s19 = sphi %s671_s19, %s844_s19   ;;  %s621_s18 = sphi %s669_s18, %s843_s18  }
   0x6   : > { %s694_s24 = sadd.s32 1, %s633_s21   ;;  %s28_s25 = sadd.s32 1, %s629_s20 }
   0x7   : > { %s25_s26 = ssub.s32 %s633_s21, %s694_s24  ;;  %p35_p0 = scmp.ne.s32.totalorder %s629_s20, %s625_s19 }
   0x8   : > { %p26_p1 = scmp.eq.s32.totalorder %s25_s26, 0  ;;  %p36_p2 = scmp.eq.s32.totalorder %s633_s21, 0 }
   0x9   : > { %p41_p3 = scmp.ne.s32.totalorder %s625_s19, %s621_s18  ;;  %p42_p4 = scmp.eq.s32.totalorder %s690_s22, 0 }
   0xa   : > { %s706_s27 = scalar_select %p26_p1, %s629_s20, %s28_s25  }
   0xb   : > { %p708_p5 = por %p36_p2, %p35_p0  ;;  %p712_p6 = por %p42_p4, %p41_p3 }
   0xc   : > { %p149_p7 = scmp.eq.s32.totalorder %s690_s22, 1  ;;  %p155_p8 = scmp.eq.s32.totalorder %s456_s23, 1 }
   0xd   : > { %p492_p10 = scmp.lt.s32.totalorder %s633_s21, 2  ;;  %s187_s7 = sand.u32 1, %s629_s20  }
   0xe   : > { %p719_p11 = por %p149_p7, %p35_p0  ;;  %p723_p12 = por %p155_p8, %p41_p3 }
   0xf   : > { %s477_s8 = sshll.u32 %s633_s21, 5  ;;  %s459_s9 = sshll.u32 %s187_s7, 5 }
  0x10   : > { %s197_s12 = scalar_lea.hbm %s831_s0, %s477_s8  ;;  %s191_s14 = scalar_lea.vmem [#allocation2], %s459_s9 }
  0x11   : > { %s198_s13 = sshll.u32 %s197_s12, 4  ;;  %s200_s15 = sshll.u32 %s191_s14, 4  ;;  %s199_s13 = int_to_ptr.hbm [resolvable:$true] %s198_s13  ;;  %s201_s15 = int_to_ptr.vmem [resolvable:$true] %s200_s15 }
  0x12   : > { %p734_p13 = pnand %p492_p10, %p708_p5  ;;  %p463_p0 = scmp.ge.s32.totalorder %s633_s21, 1 }
  0x13   : > { %p208_p1 = scmp.lt.s32.totalorder %s633_s21, 3  ;;  %s188_s17 = scalar_lea.sflag [#allocation3], %s187_s7 }
  0x14   : > { %s537_s23 = sshra.s32 %s199_s13, 4  ;;  %p541_p3 = pneg %p734_p13  ;;  %s538_s23 = int_to_ptr.hbm [resolvable:$true] %s537_s23 }
  0x15   : > { %s539_s25 = scalar_lea.hbm %s538_s23, 32  ;;  %s544_s28 = scalar_lea.hbm %s831_s0, 64 }
  0x16   : > { %p540_p2 = scmp.ne.s32.totalorder %s538_s23, %s539_s25  ;;  %p545_p5 = scmp.lt.s32.totalorder %s538_s23, %s831_s0 }
  0x17   : > { %p546_p8 = scmp.lt.s32.totalorder %s544_s28, %s539_s25 }
  0x18   : > { %p542_p4 = pnand %p541_p3, %p540_p2 }
  0x19   : > { %p547_p10 = por %p546_p8, %p545_p5 }
  0x1a   : > { %p543_p7 = pneg %p542_p4 }
  0x1c   : > { %p548_p9 = pnand %p547_p10, %p543_p7 }
  0x1e   : > { %551 = shalt.err (!%p548_p9)
}
  0x1f   : > { %s635_s7 = smov 256   ;;  %s636_s11 = smov 16  }
  0x20   : > { %487 = dma.hbm_to_vmem [thread:$0]  (!%p734_p13), %s199_s13, 512, %s201_s15, %s188_s17, %s635_s7, %s635_s7, %s636_s11  }
  0x21   : > { %p209_p2 = pnand %p463_p0, %p208_p1 }
  0x22   : > { %s755_s12 = sand.u32 (!%p209_p2), 1, %s625_s19  }
  0x23   : > { %212 = sbr.rel (%p209_p2) target bundleno = 599 (0x257), region = 40  ;;  %s464_s14 = sshll.u32 (!%p209_p2), %s755_s12, 5 }
  0x24   : > { %s215_s23 = scalar_lea.sflag (!%p209_p2), [#allocation3], %s755_s12  ;;  %s218_s25 = scalar_lea.vmem (!%p209_p2), [#allocation2], %s464_s14 }
  0x28   : > { %612 = dma.done.wait (%p712_p6), %s215_s23, 512  }
  0x29   : > { %614 = vsyncadd (%p712_p6), %s215_s23, 4294966784  ;;  %v765_v0 = vld [vmem:[%s218_s25] sm:$0xff]  ;;  %v767_v1 = vld [vmem:[%s218_s25 + $0x8] sm:$0xff]  ;;  %v265_v9 = vlaneseq  ;;  %vm270_vm0 = vcmask 130112   ;;  %vm272_vm1 = vcmask 130048   ;;  %vm302_vm2 = vcmask 1041408  }
  0x2a   : > { %v252_v2 = vadd.f32 %v767_v1, %v765_v0  ;;  %v771_v3 = vld [vmem:[%s218_s25 + $0x10] sm:$0xff]  ;;  %v773_v4 = vld [vmem:[%s218_s25 + $0x18] sm:$0xff]  ;;  %v261_v6 = vld [vmem:[%s832_s1 + $0x8] sm:$0xff]  ;;  %vm298_vm3 = vcmask 15360   ;;  %s245_s7 = scalar_lea.vmem [#allocation5], %s464_s14  ;;  %s479_s11 = sshll.u32 %s690_s22, 5 }
  0x2b   : > { %v255_v5 = vadd.f32 %v773_v4, %v771_v3  ;;  %289 = vmatpush.msra.mxu0 %v261_v6  ;;  %v260_v7 = vld [vmem:[%s832_s1] sm:$0xff]  ;;  %v266_v10 = vand.u32 127, %v265_v9  ;;  %v347_v23 = vshrl.u32 %v265_v9, 7  ;;  %s379_s13 = scalar_lea.hbm %s836_s5, %s479_s11  ;;  %s380_s15 = sshll.u32 %s245_s7, 4  ;;  %s381_s15 = int_to_ptr.vmem [resolvable:$true] %s380_s15 }
  0x2c   : > { %253 = vadd.xlane.f32.xlu0 %v252_v2  ;;  %v296_v18 = vld [vmem:[%s834_s3] sm:$0x3]  ;;  %s382_s29 = sshll.u32 %s379_s13, 4  ;;  %s367_s14 = scalar_lea.sflag [#allocation4], %s755_s12  ;;  %s383_s29 = int_to_ptr.hbm [resolvable:$true] %s382_s29 }
  0x2d   : > { %290 = vmatpush.msra.mxu0 %v260_v7  ;;  %v268_v12 = vadd.s32 4294967288, %v266_v10  ;;  %467 = vmatpush.msk.msra.mxu1 %vm302_vm2, %v296_v18  ;;  %v262_v19 = vld [vmem:[%s833_s2] sm:$0x1]  ;;  %v354_v24 = vadd.s32 8, %v347_v23  ;;  %s581_s16 = sshra.s32 %s383_s29, 4  ;;  %s587_s8 = scalar_lea.hbm %s836_s5, 64  ;;  %s582_s16 = int_to_ptr.hbm [resolvable:$true] %s581_s16 }
  0x2e   : > { %530 = vset.pattern.permute.xlu1 %v347_v23  ;;  %v297_v25 = vld [vmem:[%s835_s4] sm:$0x1]  ;;  %s583_s22 = scalar_lea.hbm %s582_s16, 32  ;;  %p588_p0 = scmp.lt.s32.totalorder %s582_s16, %s836_s5 }
  0x2f   : > { %532 = vset.pattern.permute.xlu0 %v354_v24  ;;  %p584_p6 = scmp.ne.s32.totalorder %s582_s16, %s583_s22  ;;  %p589_p1 = scmp.lt.s32.totalorder %s587_s8, %s583_s22 }
  0x31   : > { %p585_p9 = pnand %p584_p6, %p719_p11  ;;  %p590_p3 = por %p589_p1, %p588_p0 }
  0x33   : > { %p586_p13 = pneg %p585_p9 }
  0x34   : > { %256 = vadd.xlane.f32.xlu0 %v255_v5 }
  0x35   : > { %p591_p4 = pnand %p590_p3, %p586_p13 }
  0x9f   : > { %v254_v8 = vpop.xlane.xlu0 %253 }
  0xa0   : > { %v258_v11 = vmul.f32 0.00390625, %v254_v8 }
  0xa2   : > { %v267_v15 = vperm.slane %v258_v11, %v266_v10 }
  0xa7   : > { %v257_v13 = vpop.xlane.xlu0 %256 }
  0xa8   : > { %v259_v14 = vmul.f32 0.00390625, %v257_v13 }
  0xaa   : > { %v269_v16 = vperm.slane %v259_v14, %v268_v12 }
  0xac   : > { %v271_v17 = vsel %vm270_vm0, %v269_v16, %v267_v15 }
  0xad   : > { %466 = vmatmul.msk.f32.vlgmr.msra.gmra.mxu0 %vm272_vm1, %v271_v17 }
 0x12a   : > { %v292_v20 = vpop.f32.mrf.mxu0 }
 0x12b   : > { %v293_v21 = vadd.f32 %v292_v20, %v262_v19 }
 0x12d   : > { %v295_v22 = vmax.f32 %v293_v21, 0.0 }
 0x12f   : > { %468 = vmatmul.msk.f32.vlgmr.msra.gmra.mxu1 %vm298_vm3, %v295_v22 }
 0x1ac   : > { %v323_v26 = vpop.f32.mrf.mxu1 }
 0x1ad   : > { %v324_v27 = vadd.f32 %v323_v26, %v297_v25 }
 0x1af   : > { %v469_v28 = vmul.f32 -1.442695, %v324_v27 }
 0x1b1   : > { %533 = vpow2.f32 %v469_v28 }
 0x1b7   : > { %v534_v29 = vpop.eup %533 }
 0x1b8   : > { %v329_v30 = vadd.f32 1.0, %v534_v29 }
 0x1ba   : > { %535 = vrcp.f32 %v329_v30  ;;  %v341_v34 = vand.u32 2147483648, %v329_v30  ;;  %v339_v36 = vand.u32 2147483647, %v329_v30  ;;  %vm335_vm5 = vweird.f32 %v329_v30 }
 0x1bc   : > { %v342_v38 = vor.u32 1.1754944e-38, %v341_v34  ;;  %vm340_vm7 = vcmp.eq.f32.partialorder %v339_v36, 8.507059e+37 }
 0x1c0   : > { %v536_v31 = vpop.eup %535 }
 0x1c1   : > { %v331_v32 = vmul.f32 %v536_v31, %v329_v30  ;;  %vm336_vm4 = vweird.f32 %v536_v31 }
 0x1c2   : > { %vm337_vm6 = vmor %vm335_vm5, %vm336_vm4 }
 0x1c3   : > { %v332_v33 = vsub.f32 1.0, %v331_v32 }
 0x1c5   : > { %v333_v35 = vmul.f32 %v536_v31, %v332_v33 }
 0x1c7   : > { %v334_v37 = vadd.f32 %v536_v31, %v333_v35 }
 0x1c9   : > { %v338_v39 = vsel %vm337_vm6, %v536_v31, %v334_v37 }
 0x1ca   : > { %v343_v40 = vsel %vm340_vm7, %v342_v38, %v338_v39 }
 0x1cb   : > { %v345_v41 = vperm.slane %v343_v40, 0 }
 0x1cd   : > { %350 = vperm.xlu1 %530, %v345_v41  }
 0x1d5   : > { %531 = vset.pattern.permute.xlu1 %v354_v24 }
 0x1dd   : > { %356 = vperm.xlu1 %531, %v345_v41  }
 0x23f   : > { %v351_v42 = vpop.permute.xlu1 %350 }
 0x240   : > { %v358_v43 = vmul.f32 %v351_v42, %v765_v0  ;;  %v359_v44 = vmul.f32 %v351_v42, %v767_v1 }
 0x242   : > { %362 = vst [vmem:[%s245_s7] sm:$0xff] %v358_v43 }
 0x243   : > { %363 = vst [vmem:[%s245_s7 + $0x8] sm:$0xff] %v359_v44 }
 0x24f   : > { %v357_v45 = vpop.permute.xlu1 %356 }
 0x250   : > { %v360_v46 = vmul.f32 %v357_v45, %v771_v3  ;;  %v361_v47 = vmul.f32 %v357_v45, %v773_v4 }
 0x252   : > { %364 = vst [vmem:[%s245_s7 + $0x10] sm:$0xff] %v360_v46 }
 0x253   : > { %365 = vst [vmem:[%s245_s7 + $0x18] sm:$0xff] %v361_v47 }
 0x254   : > { %594 = shalt.err (!%p591_p4)
}
 0x255   : > { %s637_s12 = smov 256   ;;  %s638_s10 = smov 16  }
 0x256   : > { %482 = dma.vmem_to_hbm [thread:$0]  (%p719_p11), %s381_s15, 512, %s383_s29, %s367_s14, %s637_s12, %s637_s12, %s638_s10  }
 0x257 PF: > { %s397_s7 = sand.u32 1, %s621_s18   ;;  %p842_p7 = scmp.ge.s32.totalorder %s633_s21, 2 }
 0x258   : > { %s398_s11 = scalar_lea.sflag [#allocation4], %s397_s7 }
 0x259   : > { %p489_p5 = pnand %p842_p7, %p723_p12 }
 0x25b   : > { %p490_p8 = pneg %p489_p5 }
 0x25d   : > { %616 = dma.done.wait (%p490_p8), %s398_s11, 512  }
 0x25e   : > { %618 = vsyncadd (%p490_p8), %s398_s11, 4294966784  ;;  %p18_p10 = scmp.ge.s32.totalorder %s694_s24, 4   ;;  %s843_s18 = smov %s625_s19 }
 0x25f   : > { %s844_s19 = smov %s629_s20  ;;  %s845_s20 = smov %s706_s27 }
 0x260   : > { %s846_s21 = smov %s694_s24  ;;  %20 = sbr.rel (!%p18_p10) target bundleno = 5 (0x5), region = 85 }
 0x265   :  { %404 = vsyncpa [#allocation3], 1 }
 0x266   :  { %406 = vsyncpa [#allocation3 + $0x1], 1 }
 0x267   :  { %407 = vsyncpa [#allocation4], 1 }
 0x268   :  { %409 = vsyncpa [#allocation4 + $0x1], 1 }

</bundles_post_ra>
